<compile_context>
chip_gen: v5e
topology: v5e:2x2
jax: 0.10.0
libtpu: 0.0.40
codegen_flags: <defaults>
</compile_context>

<pallas_src>
import jax
import jax.numpy as jnp
from jax.experimental import pallas as pl
from jax.experimental.pallas import tpu as pltpu


_LANE = 128            # TPU lane width (last-dim vreg extent)
_FALLBACK_LANE = 512   # lane-dense width used when flattening unaligned inputs


# ---------------------------------------------------------------------------
# Pallas kernel: elementwise hard zero-threshold (the STE forward hot path)
# ---------------------------------------------------------------------------
def _ste_zero_kernel(s_ref, z_ref):
    # one vcmp + one convert per vreg; no broadcast constants materialized
    z_ref[...] = (s_ref[...] > 0).astype(z_ref.dtype)


def _min_sublane(dtype) -> int:
    """Sublane packing granularity for a dtype (second-to-last dim multiple)."""
    itemsize = jnp.dtype(dtype).itemsize
    if itemsize >= 4:
        return 8
    if itemsize == 2:
        return 16
    return 32


def _round_up(x: int, m: int) -> int:
    return (x + m - 1) // m * m


def _target_block_bytes() -> int:
    """Per-block byte budget, generation-aware.

    Default ~4 MiB: 2 input + 2 output double-buffers => ~16 MiB live, which
    fits v6e/v7x scoped defaults and (with the explicit vmem_limit below)
    v5e as well.  On chips with <=64 MiB physical VMEM (v7x, 3.2 TB/s HBM)
    bump to ~8 MiB to amortize the per-grid-step overhead; 4 x 8 MiB = 32 MiB
    live still leaves headroom under 64 MiB physical.
    """
    target = 4 * 1024 * 1024
    try:
        info = pltpu.get_tpu_info()
        vmem = getattr(info, "vmem_capacity_bytes", None)
        if vmem is not None and vmem <= 64 * 1024 * 1024:
            target = 8 * 1024 * 1024
    except Exception:
        pass  # conservative default is safe on every generation
    return target


def _ste_zero_2d(s2: jax.Array) -> jax.Array:
    """Run the Pallas kernel on a 2-D, lane-aligned (last dim % 128 == 0) array."""
    B, D = s2.shape
    dtype = s2.dtype
    itemsize = jnp.dtype(dtype).itemsize
    sub = _min_sublane(dtype)
    target = _target_block_bytes()

    row_bytes = D * itemsize
    min_block_bytes = sub * row_bytes  # smallest legal full-D block

    if min_block_bytes > target:
        # Wide-D: tile the lane axis too (multiples of 128) so a block stays
        # within budget.  Keeps 4 live buffers bounded even for huge D.
        tile_b = min(sub, B)
        tile_d = max(_LANE, (target // (sub * itemsize)) // _LANE * _LANE)
        tile_d = min(tile_d, D)
    else:
        # Common case: full-D (fully contiguous, lane-dense) blocks, tile B.
        tile_d = D
        tile_b = max(sub, (target // row_bytes) // sub * sub)
        if tile_b >= B:
            tile_b = B  # full-extent dim is always legal
            total_bytes = B * row_bytes
            # Megacore: for medium/large tensors keep >=2 "parallel" grid
            # steps so v7x's two TensorCores both participate.
            if total_bytes > 512 * 1024 and B >= 2 * sub:
                tile_b = _round_up(pl.cdiv(B, 2), sub)

    grid = (pl.cdiv(B, tile_b), pl.cdiv(D, tile_d))

    return pl.pallas_call(
        _ste_zero_kernel,
        out_shape=jax.ShapeDtypeStruct((B, D), dtype),
        grid_spec=pltpu.PrefetchScalarGridSpec(
            num_scalar_prefetch=0,
            grid=grid,
            in_specs=[pl.BlockSpec((tile_b, tile_d), lambda i, j: (i, j))],
            out_specs=pl.BlockSpec((tile_b, tile_d), lambda i, j: (i, j)),
        ),
        compiler_params=pltpu.CompilerParams(
            # Purely elementwise: both grid axes are independent.
            dimension_semantics=("parallel", "parallel"),
            # Explicit limit so 4 x (4-8) MiB live buffers are fine on v5e's
            # 16 MiB scoped default and still under v7x's 64 MiB physical.
            vmem_limit_bytes=48 * 1024 * 1024,
        ),
    )(s2)


def _ste_zero_flat(s: jax.Array) -> jax.Array:
    """Fallback for non-lane-aligned last dims: flatten + pad to a lane-dense
    (rows, 512) view so stores are wide and unmasked, then un-pad."""
    n = s.size
    dtype = s.dtype
    sub = _min_sublane(dtype)
    chunk = sub * _FALLBACK_LANE
    n_pad = _round_up(max(n, 1), chunk)
    flat = s.reshape(-1)
    if n_pad != n:
        flat = jnp.pad(flat, (0, n_pad - n))  # zeros -> (0 > 0) = 0, sliced off
    z = _ste_zero_2d(flat.reshape(n_pad // _FALLBACK_LANE, _FALLBACK_LANE))
    return z.reshape(-1)[:n].reshape(s.shape)


def ste_zero_hard(s: jax.Array) -> jax.Array:
    """Forward value of ste_zero: (s > 0) as s.dtype, computed in Pallas."""
    if s.ndim >= 2 and s.shape[-1] >= _LANE and s.shape[-1] % _LANE == 0:
        s2 = s.reshape(-1, s.shape[-1])
        return _ste_zero_2d(s2).reshape(s.shape)
    return _ste_zero_flat(s)


# ---------------------------------------------------------------------------
# Straight-through estimator wrapper (identity gradient w.r.t. s)
# ---------------------------------------------------------------------------
@jax.custom_vjp
def ste_zero(s):
    return ste_zero_hard(s)


def _ste_zero_fwd(s):
    return ste_zero_hard(s), None


def _ste_zero_bwd(_, g):
    return (g,)  # straight-through: pass gradient unchanged to s


ste_zero.defvjp(_ste_zero_fwd, _ste_zero_bwd)


# ---------------------------------------------------------------------------
# Module wrapper mirroring the PyTorch class
# ---------------------------------------------------------------------------
class LatentSTEZero:
    def __init__(self):
        self.latent_config = None

    def set_latent_config(self, latent_config):
        self.latent_config = latent_config

    def __call__(self, s, decoder, X, y):
        # TODO(synk): exact source of ste_zero(s, decoder, X, y, latent_config) is
        # unavailable; the forward value is implemented as zero-threshold hard
        # binarization with a straight-through gradient; decoder/X/y/latent_config
        # are accepted but do not affect the forward value here.
        del decoder, X, y
        return ste_zero(s)


# ---------------------------------------------------------------------------
# Demo / self-check
# ---------------------------------------------------------------------------
if __name__ == "__main__":
    key = jax.random.PRNGKey(0)
    k_s, k_w, k_x, k_y = jax.random.split(key, 4)

    B, D = 8, 256          # batch, latent_dim (small, lane-aligned)
    X_DIM = 16

    # latent scores (centered so roughly half are > 0)
    s = jax.random.normal(k_s, (B, D), dtype=jnp.float32)

    # deterministic "decoder": a simple linear map params (unused by forward value)
    decoder_w = jax.random.normal(k_w, (D, X_DIM), dtype=jnp.float32) * 0.02

    def decoder(z):
        return z @ decoder_w

    X = jax.random.normal(k_x, (B, X_DIM), dtype=jnp.float32)
    y = jax.random.normal(k_y, (B,), dtype=jnp.float32)

    model = LatentSTEZero()
    model.set_latent_config({"threshold": 0.0})

    z = jax.block_until_ready(model(s, decoder, X, y))

    # reference check
    z_ref = (s > 0).astype(s.dtype)
    assert z.shape == (B, D) and z.dtype == s.dtype
    assert jnp.array_equal(z, z_ref), "Pallas ste_zero forward mismatch"

    # straight-through gradient sanity check (identity w.r.t. s)
    g = jax.grad(lambda ss: jnp.sum(ste_zero(ss) * 2.0))(s)
    assert jnp.allclose(g, 2.0 * jnp.ones_like(s))

    # multi-block path: tiled over B with >=2 grid steps (megacore-friendly)
    s_big = jax.random.normal(k_s, (2048, 1024), dtype=jnp.float32)
    z_big = jax.block_until_ready(ste_zero_hard(s_big))
    assert jnp.array_equal(z_big, (s_big > 0).astype(s_big.dtype))

    # wide-D path: exercises the lane-axis tiling guard (bounded VMEM)
    s_wide = jax.random.normal(k_s, (4, 512 * 1024), dtype=jnp.float32)
    z_wide = jax.block_until_ready(ste_zero_hard(s_wide))
    assert jnp.array_equal(z_wide, (s_wide > 0).astype(s_wide.dtype))

    # non-lane-aligned last dim: flatten + pad to lane-dense layout
    s_odd = jax.random.normal(k_s, (7, 200), dtype=jnp.float32)
    z_odd = jax.block_until_ready(ste_zero_hard(s_odd))
    assert jnp.array_equal(z_odd, (s_odd > 0).astype(s_odd.dtype))

    print("KERNEL_OK")
</pallas_src>

<mosaic_0001>
module attributes {stable_mosaic.version = 11 : i64} {
  func.func @_ste_zero_kernel(%arg0: i32, %arg1: i32, %arg2: memref<8x256xf32, #tpu.memory_space<vmem>>, %arg3: memref<8x256xf32, #tpu.memory_space<vmem>>) attributes {dimension_semantics = [#tpu.dimension_semantics<parallel>, #tpu.dimension_semantics<parallel>], iteration_bounds = array<i64: 1, 1>, scalar_prefetch = 0 : i64, scratch_operands = 0 : i64, tpu.core_type = #tpu.core_type<tc>, window_params = [{transform_indices = @transform_0, window_bounds = array<i64: 8, 256>}, {transform_indices = @transform_1, window_bounds = array<i64: 8, 256>}]} {
    %c0 = arith.constant 0 : index
    %c0_0 = arith.constant 0 : index
    %0 = vector.load %arg2[%c0, %c0_0] : memref<8x256xf32, #tpu.memory_space<vmem>>, vector<8x256xf32>
    %cst = arith.constant 0.000000e+00 : f32
    %1 = vector.broadcast %cst : f32 to vector<8x256xf32>
    %2 = arith.cmpf ogt, %0, %1 : vector<8x256xf32>
    %3 = arith.extui %2 : vector<8x256xi1> to vector<8x256xi32>
    %4 = arith.sitofp %3 : vector<8x256xi32> to vector<8x256xf32>
    %c0_1 = arith.constant 0 : index
    %c0_2 = arith.constant 0 : index
    %5 = vector.load %arg3[%c0_1, %c0_2] : memref<8x256xf32, #tpu.memory_space<vmem>>, vector<8x256xf32>
    tpu.vector_store %arg3[%c0_1, %c0_2], %4 {strides = array<i32>} : memref<8x256xf32, #tpu.memory_space<vmem>>, vector<8x256xf32>,
    return
  }
  func.func @transform_0(%arg0: i32, %arg1: i32) -> (i32, i32) {
    %c0_i32 = arith.constant 0 : i32
    return %arg0, %arg1 : i32, i32
  }
  func.func @transform_1(%arg0: i32, %arg1: i32) -> (i32, i32) {
    %c0_i32 = arith.constant 0 : i32
    return %arg0, %arg1 : i32, i32
  }
}

</mosaic_0001>

<bundles_post_ra>
// kernel: tpu_custom_call.1
= control target key start
LH: loop header
LB: loop body
LE: loop exit
PB: predicated region body
PF: predicated region fallthrough
CT: control target
= control target key end

     0   :  { %6 = vsyncpa [#allocation3], 0  ;;  %s126_s0 = inlined_call_operand.hbm [shape: f32[8,256], index: 0, kind: input, shape index: {}]   ;;  %s127_s1 = inlined_call_operand.hbm [shape: f32[8,256], index: 1, kind: output, shape index: {}]  }
   0x1   :  { %7 = vsyncpa [#allocation4], 0  ;;  %s13_s8 = sshll.u32 %s126_s0, 4  ;;  %s107_s9 = smov [#allocation2]   ;;  %s14_s8 = int_to_ptr.hbm [resolvable:$true] %s13_s8 }
   0x2   :  { %s15_s10 = sshll.u32 %s107_s9, 4  ;;  %s16_s10 = int_to_ptr.vmem [resolvable:$true] %s15_s10 }
   0x3   :  { %18 = dma.hbm_to_vmem [thread:$0]  %s14_s8, 256, %s16_s10, [#allocation3]  }
   0x4   :  { %103 = dma.done.wait [#allocation3], 256  }
   0x5   :  { %104 = vsyncadd [#allocation3], 4294967040  ;;  %s108_s11 = smov [#allocation5]   ;;  %s40_s15 = sshll.u32 %s127_s1, 4  ;;  %v23_v0 = vld [vmem:[#allocation2] sm:$0xff]  ;;  %v24_v1 = vld [vmem:[#allocation2 + $0x8] sm:$0xff]  ;;  %s41_s15 = int_to_ptr.hbm [resolvable:$true] %s40_s15 }
   0x6   :  { %s38_s12 = sshll.u32 %s108_s11, 4  ;;  %vm25_vm0 = vcmp.gt.f32.partialorder %v23_v0, 0.0  ;;  %vm26_vm1 = vcmp.gt.f32.partialorder %v24_v1, 0.0  ;;  %v109_v2 = vmov 0.0   ;;  %s39_s12 = int_to_ptr.vmem [resolvable:$true] %s38_s12 }
   0x7   :  { %v50_v3 = vsel %vm25_vm0, 1.0, %v109_v2  ;;  %v51_v4 = vsel %vm26_vm1, 1.0, %v109_v2 }
   0x8   :  { %31 = vst [vmem:[#allocation5] sm:$0xff] %v50_v3 }
   0x9   :  { %32 = vst [vmem:[#allocation5 + $0x8] sm:$0xff] %v51_v4 }
   0xa   :  { %43 = dma.vmem_to_hbm [thread:$0]  %s39_s12, 256, %s41_s15, [#allocation4]  }
   0xb   :  { %105 = dma.done.wait [#allocation4], 256  }
   0xc   :  { %106 = vsyncadd [#allocation4], 4294967040 }
   0xd   :  { %48 = vsyncpa [#allocation3], 1 }
   0xe   :  { %49 = vsyncpa [#allocation4], 1 }

</bundles_post_ra>
